<compile_context>
chip_gen: v5e
topology: v5e:2x2
jax: 0.10.0
libtpu: 0.0.40
codegen_flags: <defaults>
</compile_context>

<pallas_src>
import functools

import jax
import jax.numpy as jnp
from jax.experimental import pallas as pl
from jax.experimental.pallas import tpu as pltpu

LANES = 128                      # channel lane padding
MATMUL_DTYPE = jnp.bfloat16      # set to jnp.float32 for bit-exact f32 matmuls


# ------------------------------ kernel helpers -------------------------------

def _bn_relu(v, gamma, beta, count, eps):
    """Training-mode BatchNorm1d (batch stats, biased var) + ReLU, per lane."""
    inv = 1.0 / float(count)
    mean = jnp.sum(v, axis=0, keepdims=True) * inv          # (1, CP)
    c = v - mean
    var = jnp.sum(c * c, axis=0, keepdims=True) * inv       # biased variance
    scale = jax.lax.rsqrt(var + eps) * gamma
    return jnp.maximum(c * scale + beta, 0.0)


def _conv_taps(h, a_ref, w_ref, bias, ksize, out_rows, lanes):
    """K-tap Conv1d: per-tap 0/1 row-selection matmul (handles padding, stride
    and batch boundaries) followed by a (CP, CP) weight matmul on the MXU."""
    hb = h.astype(MATMUL_DTYPE)
    acc = jnp.zeros((out_rows, lanes), jnp.float32)
    for k in range(ksize):
        sel = a_ref[k].astype(MATMUL_DTYPE)                  # 0/1 exact in bf16
        hk = jnp.dot(sel, hb, preferred_element_type=jnp.float32)
        acc = acc + jnp.dot(hk.astype(MATMUL_DTYPE), w_ref[k],
                            preferred_element_type=jnp.float32)
    return acc + bias


def _rsu_kernel(x_ref, g1_ref, bt1_ref, w1_ref, cb1_ref,
                g2_ref, bt2_ref, w2_ref, cb2_ref,
                a1_ref, a2_ref, o_ref, *, ksize, pad, eps, stride):
    """Whole RSU forward pass; all intermediates stay in VMEM/vregs."""
    nl, cp = x_ref.shape                                     # (N*L, 128)
    nl1, _ = o_ref.shape                                     # (N*L1, 128)

    x = x_ref[...]                                           # f32

    # ---- BRC stage 1: BN(Cin) -> ReLU -> Conv1d(Cin->Cout, stride) ----------
    h1 = _bn_relu(x, g1_ref[...], bt1_ref[...], nl, eps)
    y1 = _conv_taps(h1, a1_ref, w1_ref, cb1_ref[...], ksize, nl1, cp)

    # ---- BRC stage 2: BN(Cout) -> ReLU -> Conv1d(Cout->Cout, stride 1) ------
    h2 = _bn_relu(y1, g2_ref[...], bt2_ref[...], nl1, eps)
    y2 = _conv_taps(h2, a2_ref, w2_ref, cb2_ref[...], ksize, nl1, cp)

    # ---- residual ------------------------------------------------------------
    # AvgPool1d(kernel_size=1, stride=2) == picking every 2nd row, which is
    # exactly the centre-tap selection matrix of conv1.  The zero-channel
    # concat (Cin != Cout) is implicit: lanes >= Cin of x are already zero.
    if stride == 1:
        res = x
    else:
        res = jnp.dot(a1_ref[pad], x, preferred_element_type=jnp.float32)

    o_ref[...] = y2 + res


# ------------------------- parameter packing (once) --------------------------

def _pad_row(v, lanes=LANES):
    """1-D per-channel vector -> (1, 128) f32, zero-padded."""
    return jnp.zeros((1, lanes), jnp.float32).at[0, :v.shape[0]].set(
        v.astype(jnp.float32))


def _pack_conv_weight(w, lanes=LANES):
    """PyTorch Conv1d weight (Cout, Cin, K) -> per-tap (K, 128, 128) in the
    MXU matmul dtype (pre-cast once, halves weight HBM traffic for bf16)."""
    cout, cin, k = w.shape
    wp = jnp.zeros((k, lanes, lanes), MATMUL_DTYPE)
    return wp.at[:, :cin, :cout].set(
        jnp.transpose(w, (2, 1, 0)).astype(MATMUL_DTYPE))


def init_rsu_params(key, in_channels, out_channels, kernel_size=3):
    """PyTorch-default init; pre-padded / pre-transposed once for the kernel."""
    k1, k2, k3, k4 = jax.random.split(key, 4)
    s1 = 1.0 / float(in_channels * kernel_size) ** 0.5
    s2 = 1.0 / float(out_channels * kernel_size) ** 0.5
    w1 = jax.random.uniform(k1, (out_channels, in_channels, kernel_size),
                            jnp.float32, -s1, s1)
    cb1 = jax.random.uniform(k2, (out_channels,), jnp.float32, -s1, s1)
    w2 = jax.random.uniform(k3, (out_channels, out_channels, kernel_size),
                            jnp.float32, -s2, s2)
    cb2 = jax.random.uniform(k4, (out_channels,), jnp.float32, -s2, s2)
    return {
        "g1": _pad_row(jnp.ones((in_channels,), jnp.float32)),    # BN1 weight
        "bt1": _pad_row(jnp.zeros((in_channels,), jnp.float32)),  # BN1 bias
        "w1": _pack_conv_weight(w1), "cb1": _pad_row(cb1),
        "g2": _pad_row(jnp.ones((out_channels,), jnp.float32)),   # BN2 weight
        "bt2": _pad_row(jnp.zeros((out_channels,), jnp.float32)), # BN2 bias
        "w2": _pack_conv_weight(w2), "cb2": _pad_row(cb2),
    }


# -------------------------- selection-matrix builder -------------------------

def _tap_selectors(n, lin, lout, stride, ksize, pad):
    """(K, n*lout, n*lin) 0/1 matrices: tap k of output row (b, i) reads input
    row (b, stride*i + k - pad), or zero (conv zero-padding / batch boundary).
    Built from iota only -> constant-folded by XLA."""
    i = jnp.arange(lout)
    cols = jnp.arange(lin)
    taps = []
    for k in range(ksize):
        j = stride * i + k - pad                                     # (lout,)
        hit = ((j[:, None] == cols[None, :])
               & (j >= 0)[:, None] & (j < lin)[:, None])
        taps.append(hit.astype(jnp.float32))
    per_tap = jnp.stack(taps)                                        # (K, lout, lin)
    full = jnp.zeros((ksize, n * lout, n * lin), jnp.float32)
    for b in range(n):                                               # block-diag over batch
        full = full.at[:, b * lout:(b + 1) * lout,
                       b * lin:(b + 1) * lin].set(per_tap)
    return full


# ---------------------------------- forward ----------------------------------

def rsu_forward(params, x_ncl, *, in_channels, out_channels,
                kernel_size=3, down_sample=False):
    """RSU.forward.  x_ncl: (N, C_in, L), returns (N, C_out, L_out)."""
    assert kernel_size == 3, "padding=1 residual add only type-checks for K=3"
    N, cin, L = x_ncl.shape
    assert cin == in_channels and in_channels <= LANES and out_channels <= LANES
    # torch only shape-checks when Cout == Cin or Cout == 2*Cin (zero concat).
    assert out_channels in (in_channels, 2 * in_channels)
    pad = 1
    stride = 2 if down_sample else 1
    L1 = (L + 2 * pad - kernel_size) // stride + 1           # BRC output length
    NL, NL1 = N * L, N * L1

    # One-time layout glue: (N, C, L) -> flat rows (N*L, 128), lanes >= Cin zero.
    x_nlc = jnp.transpose(x_ncl, (0, 2, 1)).astype(jnp.float32)
    xf = jnp.zeros((NL, LANES), jnp.float32).at[:, :cin].set(
        x_nlc.reshape(NL, cin))

    # Per-tap selection matrices (conv1 with stride, conv2 stride 1).
    a1 = _tap_selectors(N, L, L1, stride, kernel_size, pad)   # (K, NL1, NL)
    a2 = _tap_selectors(N, L1, L1, 1, kernel_size, pad)       # (K, NL1, NL1)

    kernel = functools.partial(_rsu_kernel, ksize=kernel_size, pad=pad,
                               eps=1e-5, stride=stride)
    vmem = pl.BlockSpec(memory_space=pltpu.MemorySpace.VMEM)
    out = pl.pallas_call(
        kernel,
        out_shape=jax.ShapeDtypeStruct((NL1, LANES), jnp.float32),
        in_specs=[vmem] * 11,
        out_specs=vmem,
    )(xf, params["g1"], params["bt1"], params["w1"], params["cb1"],
      params["g2"], params["bt2"], params["w2"], params["cb2"], a1, a2)

    # Back to PyTorch layout / true channel count (one-time glue).
    out = out.reshape(N, L1, LANES)[:, :, :out_channels]
    return jnp.transpose(out, (0, 2, 1))


# ------------------------------------ main ------------------------------------

if __name__ == "__main__":
    key = jax.random.PRNGKey(0)
    kp1, kp2, kx1, kx2 = jax.random.split(key, 4)

    # Config 1: down_sample=True with channel expansion (4 -> 8), L=16.
    p1 = init_rsu_params(kp1, in_channels=4, out_channels=8, kernel_size=3)
    x1 = jax.random.normal(kx1, (2, 4, 16), jnp.float32)   # (N, C_in, L)
    f1 = jax.jit(functools.partial(rsu_forward, in_channels=4, out_channels=8,
                                   kernel_size=3, down_sample=True))
    y1 = jax.block_until_ready(f1(p1, x1))
    assert y1.shape == (2, 8, 8), y1.shape
    assert bool(jnp.all(jnp.isfinite(y1)))

    # Config 2: identity-shaped block (8 -> 8), no down-sampling.
    p2 = init_rsu_params(kp2, in_channels=8, out_channels=8, kernel_size=3)
    x2 = jax.random.normal(kx2, (2, 8, 16), jnp.float32)
    f2 = jax.jit(functools.partial(rsu_forward, in_channels=8, out_channels=8,
                                   kernel_size=3, down_sample=False))
    y2 = jax.block_until_ready(f2(p2, x2))
    assert y2.shape == (2, 8, 16), y2.shape
    assert bool(jnp.all(jnp.isfinite(y2)))

    print("KERNEL_OK")
</pallas_src>

<mosaic_0001>
module attributes {stable_mosaic.version = 11 : i64} {
  func.func @_rsu_kernel(%arg0: memref<32x128xf32, #tpu.memory_space<vmem>>, %arg1: memref<1x128xf32, #tpu.memory_space<vmem>>, %arg2: memref<1x128xf32, #tpu.memory_space<vmem>>, %arg3: memref<3x128x128xbf16, #tpu.memory_space<vmem>>, %arg4: memref<1x128xf32, #tpu.memory_space<vmem>>, %arg5: memref<1x128xf32, #tpu.memory_space<vmem>>, %arg6: memref<1x128xf32, #tpu.memory_space<vmem>>, %arg7: memref<3x128x128xbf16, #tpu.memory_space<vmem>>, %arg8: memref<1x128xf32, #tpu.memory_space<vmem>>, %arg9: memref<3x16x32xf32, #tpu.memory_space<vmem>>, %arg10: memref<3x16x16xf32, #tpu.memory_space<vmem>>, %arg11: memref<16x128xf32, #tpu.memory_space<vmem>>) attributes {dimension_semantics = [], scalar_prefetch = 0 : i64, scratch_operands = 0 : i64, tpu.core_type = #tpu.core_type<tc>} {
    %c0 = arith.constant 0 : index
    %c0_0 = arith.constant 0 : index
    %0 = vector.load %arg0[%c0, %c0_0] : memref<32x128xf32, #tpu.memory_space<vmem>>, vector<32x128xf32>
    %c0_1 = arith.constant 0 : index
    %c0_2 = arith.constant 0 : index
    %1 = vector.load %arg1[%c0_1, %c0_2] : memref<1x128xf32, #tpu.memory_space<vmem>>, vector<1x128xf32>
    %c0_3 = arith.constant 0 : index
    %c0_4 = arith.constant 0 : index
    %2 = vector.load %arg2[%c0_3, %c0_4] : memref<1x128xf32, #tpu.memory_space<vmem>>, vector<1x128xf32>
    %cst = arith.constant dense<0.000000e+00> : vector<128xf32>
    %3 = vector.multi_reduction <add>, %0, %cst [0] : vector<32x128xf32> to vector<128xf32>
    %4 = vector.shape_cast %3 : vector<128xf32> to vector<1x128xf32>
    %cst_5 = arith.constant 3.125000e-02 : f32
    %5 = vector.broadcast %cst_5 : f32 to vector<1x128xf32>
    %6 = arith.mulf %4, %5 : vector<1x128xf32>
    %7 = vector.broadcast %6 : vector<1x128xf32> to vector<32x128xf32>
    %8 = arith.subf %0, %7 : vector<32x128xf32>
    %9 = arith.mulf %8, %8 : vector<32x128xf32>
    %cst_6 = arith.constant dense<0.000000e+00> : vector<128xf32>
    %10 = vector.multi_reduction <add>, %9, %cst_6 [0] : vector<32x128xf32> to vector<128xf32>
    %11 = vector.shape_cast %10 : vector<128xf32> to vector<1x128xf32>
    %cst_7 = arith.constant 3.125000e-02 : f32
    %12 = vector.broadcast %cst_7 : f32 to vector<1x128xf32>
    %13 = arith.mulf %11, %12 : vector<1x128xf32>
    %cst_8 = arith.constant 9.99999974E-6 : f32
    %14 = vector.broadcast %cst_8 : f32 to vector<1x128xf32>
    %15 = arith.addf %13, %14 : vector<1x128xf32>
    %16 = math.rsqrt %15 : vector<1x128xf32>
    %17 = arith.mulf %16, %1 : vector<1x128xf32>
    %18 = vector.broadcast %17 : vector<1x128xf32> to vector<32x128xf32>
    %19 = arith.mulf %8, %18 : vector<32x128xf32>
    %20 = vector.broadcast %2 : vector<1x128xf32> to vector<32x128xf32>
    %21 = arith.addf %19, %20 : vector<32x128xf32>
    %cst_9 = arith.constant 0.000000e+00 : f32
    %22 = vector.broadcast %cst_9 : f32 to vector<32x128xf32>
    %23 = arith.maximumf %21, %22 : vector<32x128xf32>
    %c0_10 = arith.constant 0 : index
    %c0_11 = arith.constant 0 : index
    %24 = vector.load %arg4[%c0_10, %c0_11] : memref<1x128xf32, #tpu.memory_space<vmem>>, vector<1x128xf32>
    %25 = arith.truncf %23 : vector<32x128xf32> to vector<32x128xbf16>
    %cst_12 = arith.constant 0.000000e+00 : f32
    %26 = vector.broadcast %cst_12 : f32 to vector<16x128xf32>
    %c0_13 = arith.constant 0 : index
    %c0_14 = arith.constant 0 : index
    %c0_15 = arith.constant 0 : index
    %27 = vector.load %arg9[%c0_13, %c0_14, %c0_15] : memref<3x16x32xf32, #tpu.memory_space<vmem>>, vector<1x16x32xf32>
    %28 = vector.shape_cast %27 : vector<1x16x32xf32> to vector<16x32xf32>
    %29 = arith.truncf %28 : vector<16x32xf32> to vector<16x32xbf16>
    %cst_16 = arith.constant dense<0.000000e+00> : vector<16x128xf32>
    %30 = tpu.matmul %29, %25, %cst_16 {dimension_numbers = #tpu.dot_dimension_numbers<[1], [0], [0], [1], [0, 0, 1, 1], [], []>} : vector<16x32xbf16>, vector<32x128xbf16>, vector<16x128xf32> -> vector<16x128xf32>
    %31 = arith.truncf %30 : vector<16x128xf32> to vector<16x128xbf16>
    %c0_17 = arith.constant 0 : index
    %c0_18 = arith.constant 0 : index
    %c0_19 = arith.constant 0 : index
    %32 = vector.load %arg3[%c0_17, %c0_18, %c0_19] : memref<3x128x128xbf16, #tpu.memory_space<vmem>>, vector<1x128x128xbf16>
    %33 = vector.shape_cast %32 : vector<1x128x128xbf16> to vector<128x128xbf16>
    %cst_20 = arith.constant dense<0.000000e+00> : vector<16x128xf32>
    %34 = tpu.matmul %31, %33, %cst_20 {dimension_numbers = #tpu.dot_dimension_numbers<[1], [0], [0], [1], [0, 0, 1, 1], [], []>} : vector<16x128xbf16>, vector<128x128xbf16>, vector<16x128xf32> -> vector<16x128xf32>
    %35 = arith.addf %26, %34 : vector<16x128xf32>
    %c1 = arith.constant 1 : index
    %c0_21 = arith.constant 0 : index
    %c0_22 = arith.constant 0 : index
    %36 = vector.load %arg9[%c1, %c0_21, %c0_22] : memref<3x16x32xf32, #tpu.memory_space<vmem>>, vector<1x16x32xf32>
    %37 = vector.shape_cast %36 : vector<1x16x32xf32> to vector<16x32xf32>
    %38 = arith.truncf %37 : vector<16x32xf32> to vector<16x32xbf16>
    %cst_23 = arith.constant dense<0.000000e+00> : vector<16x128xf32>
    %39 = tpu.matmul %38, %25, %cst_23 {dimension_numbers = #tpu.dot_dimension_numbers<[1], [0], [0], [1], [0, 0, 1, 1], [], []>} : vector<16x32xbf16>, vector<32x128xbf16>, vector<16x128xf32> -> vector<16x128xf32>
    %40 = arith.truncf %39 : vector<16x128xf32> to vector<16x128xbf16>
    %c1_24 = arith.constant 1 : index
    %c0_25 = arith.constant 0 : index
    %c0_26 = arith.constant 0 : index
    %41 = vector.load %arg3[%c1_24, %c0_25, %c0_26] : memref<3x128x128xbf16, #tpu.memory_space<vmem>>, vector<1x128x128xbf16>
    %42 = vector.shape_cast %41 : vector<1x128x128xbf16> to vector<128x128xbf16>
    %cst_27 = arith.constant dense<0.000000e+00> : vector<16x128xf32>
    %43 = tpu.matmul %40, %42, %cst_27 {dimension_numbers = #tpu.dot_dimension_numbers<[1], [0], [0], [1], [0, 0, 1, 1], [], []>} : vector<16x128xbf16>, vector<128x128xbf16>, vector<16x128xf32> -> vector<16x128xf32>
    %44 = arith.addf %35, %43 : vector<16x128xf32>
    %c2 = arith.constant 2 : index
    %c0_28 = arith.constant 0 : index
    %c0_29 = arith.constant 0 : index
    %45 = vector.load %arg9[%c2, %c0_28, %c0_29] : memref<3x16x32xf32, #tpu.memory_space<vmem>>, vector<1x16x32xf32>
    %46 = vector.shape_cast %45 : vector<1x16x32xf32> to vector<16x32xf32>
    %47 = arith.truncf %46 : vector<16x32xf32> to vector<16x32xbf16>
    %cst_30 = arith.constant dense<0.000000e+00> : vector<16x128xf32>
    %48 = tpu.matmul %47, %25, %cst_30 {dimension_numbers = #tpu.dot_dimension_numbers<[1], [0], [0], [1], [0, 0, 1, 1], [], []>} : vector<16x32xbf16>, vector<32x128xbf16>, vector<16x128xf32> -> vector<16x128xf32>
    %49 = arith.truncf %48 : vector<16x128xf32> to vector<16x128xbf16>
    %c2_31 = arith.constant 2 : index
    %c0_32 = arith.constant 0 : index
    %c0_33 = arith.constant 0 : index
    %50 = vector.load %arg3[%c2_31, %c0_32, %c0_33] : memref<3x128x128xbf16, #tpu.memory_space<vmem>>, vector<1x128x128xbf16>
    %51 = vector.shape_cast %50 : vector<1x128x128xbf16> to vector<128x128xbf16>
    %cst_34 = arith.constant dense<0.000000e+00> : vector<16x128xf32>
    %52 = tpu.matmul %49, %51, %cst_34 {dimension_numbers = #tpu.dot_dimension_numbers<[1], [0], [0], [1], [0, 0, 1, 1], [], []>} : vector<16x128xbf16>, vector<128x128xbf16>, vector<16x128xf32> -> vector<16x128xf32>
    %53 = arith.addf %44, %52 : vector<16x128xf32>
    %54 = vector.broadcast %24 : vector<1x128xf32> to vector<16x128xf32>
    %55 = arith.addf %53, %54 : vector<16x128xf32>
    %c0_35 = arith.constant 0 : index
    %c0_36 = arith.constant 0 : index
    %56 = vector.load %arg5[%c0_35, %c0_36] : memref<1x128xf32, #tpu.memory_space<vmem>>, vector<1x128xf32>
    %c0_37 = arith.constant 0 : index
    %c0_38 = arith.constant 0 : index
    %57 = vector.load %arg6[%c0_37, %c0_38] : memref<1x128xf32, #tpu.memory_space<vmem>>, vector<1x128xf32>
    %cst_39 = arith.constant dense<0.000000e+00> : vector<128xf32>
    %58 = vector.multi_reduction <add>, %55, %cst_39 [0] : vector<16x128xf32> to vector<128xf32>
    %59 = vector.shape_cast %58 : vector<128xf32> to vector<1x128xf32>
    %cst_40 = arith.constant 6.250000e-02 : f32
    %60 = vector.broadcast %cst_40 : f32 to vector<1x128xf32>
    %61 = arith.mulf %59, %60 : vector<1x128xf32>
    %62 = vector.broadcast %61 : vector<1x128xf32> to vector<16x128xf32>
    %63 = arith.subf %55, %62 : vector<16x128xf32>
    %64 = arith.mulf %63, %63 : vector<16x128xf32>
    %cst_41 = arith.constant dense<0.000000e+00> : vector<128xf32>
    %65 = vector.multi_reduction <add>, %64, %cst_41 [0] : vector<16x128xf32> to vector<128xf32>
    %66 = vector.shape_cast %65 : vector<128xf32> to vector<1x128xf32>
    %cst_42 = arith.constant 6.250000e-02 : f32
    %67 = vector.broadcast %cst_42 : f32 to vector<1x128xf32>
    %68 = arith.mulf %66, %67 : vector<1x128xf32>
    %cst_43 = arith.constant 9.99999974E-6 : f32
    %69 = vector.broadcast %cst_43 : f32 to vector<1x128xf32>
    %70 = arith.addf %68, %69 : vector<1x128xf32>
    %71 = math.rsqrt %70 : vector<1x128xf32>
    %72 = arith.mulf %71, %56 : vector<1x128xf32>
    %73 = vector.broadcast %72 : vector<1x128xf32> to vector<16x128xf32>
    %74 = arith.mulf %63, %73 : vector<16x128xf32>
    %75 = vector.broadcast %57 : vector<1x128xf32> to vector<16x128xf32>
    %76 = arith.addf %74, %75 : vector<16x128xf32>
    %cst_44 = arith.constant 0.000000e+00 : f32
    %77 = vector.broadcast %cst_44 : f32 to vector<16x128xf32>
    %78 = arith.maximumf %76, %77 : vector<16x128xf32>
    %c0_45 = arith.constant 0 : index
    %c0_46 = arith.constant 0 : index
    %79 = vector.load %arg8[%c0_45, %c0_46] : memref<1x128xf32, #tpu.memory_space<vmem>>, vector<1x128xf32>
    %80 = arith.truncf %78 : vector<16x128xf32> to vector<16x128xbf16>
    %cst_47 = arith.constant 0.000000e+00 : f32
    %81 = vector.broadcast %cst_47 : f32 to vector<16x128xf32>
    %c0_48 = arith.constant 0 : index
    %c0_49 = arith.constant 0 : index
    %c0_50 = arith.constant 0 : index
    %82 = vector.load %arg10[%c0_48, %c0_49, %c0_50] : memref<3x16x16xf32, #tpu.memory_space<vmem>>, vector<1x16x16xf32>
    %83 = vector.shape_cast %82 : vector<1x16x16xf32> to vector<16x16xf32>
    %84 = arith.truncf %83 : vector<16x16xf32> to vector<16x16xbf16>
    %cst_51 = arith.constant dense<0.000000e+00> : vector<16x128xf32>
    %85 = tpu.matmul %84, %80, %cst_51 {dimension_numbers = #tpu.dot_dimension_numbers<[1], [0], [0], [1], [0, 0, 1, 1], [], []>} : vector<16x16xbf16>, vector<16x128xbf16>, vector<16x128xf32> -> vector<16x128xf32>
    %86 = arith.truncf %85 : vector<16x128xf32> to vector<16x128xbf16>
    %c0_52 = arith.constant 0 : index
    %c0_53 = arith.constant 0 : index
    %c0_54 = arith.constant 0 : index
    %87 = vector.load %arg7[%c0_52, %c0_53, %c0_54] : memref<3x128x128xbf16, #tpu.memory_space<vmem>>, vector<1x128x128xbf16>
    %88 = vector.shape_cast %87 : vector<1x128x128xbf16> to vector<128x128xbf16>
    %cst_55 = arith.constant dense<0.000000e+00> : vector<16x128xf32>
    %89 = tpu.matmul %86, %88, %cst_55 {dimension_numbers = #tpu.dot_dimension_numbers<[1], [0], [0], [1], [0, 0, 1, 1], [], []>} : vector<16x128xbf16>, vector<128x128xbf16>, vector<16x128xf32> -> vector<16x128xf32>
    %90 = arith.addf %81, %89 : vector<16x128xf32>
    %c1_56 = arith.constant 1 : index
    %c0_57 = arith.constant 0 : index
    %c0_58 = arith.constant 0 : index
    %91 = vector.load %arg10[%c1_56, %c0_57, %c0_58] : memref<3x16x16xf32, #tpu.memory_space<vmem>>, vector<1x16x16xf32>
    %92 = vector.shape_cast %91 : vector<1x16x16xf32> to vector<16x16xf32>
    %93 = arith.truncf %92 : vector<16x16xf32> to vector<16x16xbf16>
    %cst_59 = arith.constant dense<0.000000e+00> : vector<16x128xf32>
    %94 = tpu.matmul %93, %80, %cst_59 {dimension_numbers = #tpu.dot_dimension_numbers<[1], [0], [0], [1], [0, 0, 1, 1], [], []>} : vector<16x16xbf16>, vector<16x128xbf16>, vector<16x128xf32> -> vector<16x128xf32>
    %95 = arith.truncf %94 : vector<16x128xf32> to vector<16x128xbf16>
    %c1_60 = arith.constant 1 : index
    %c0_61 = arith.constant 0 : index
    %c0_62 = arith.constant 0 : index
    %96 = vector.load %arg7[%c1_60, %c0_61, %c0_62] : memref<3x128x128xbf16, #tpu.memory_space<vmem>>, vector<1x128x128xbf16>
    %97 = vector.shape_cast %96 : vector<1x128x128xbf16> to vector<128x128xbf16>
    %cst_63 = arith.constant dense<0.000000e+00> : vector<16x128xf32>
    %98 = tpu.matmul %95, %97, %cst_63 {dimension_numbers = #tpu.dot_dimension_numbers<[1], [0], [0], [1], [0, 0, 1, 1], [], []>} : vector<16x128xbf16>, vector<128x128xbf16>, vector<16x128xf32> -> vector<16x128xf32>
    %99 = arith.addf %90, %98 : vector<16x128xf32>
    %c2_64 = arith.constant 2 : index
    %c0_65 = arith.constant 0 : index
    %c0_66 = arith.constant 0 : index
    %100 = vector.load %arg10[%c2_64, %c0_65, %c0_66] : memref<3x16x16xf32, #tpu.memory_space<vmem>>, vector<1x16x16xf32>
    %101 = vector.shape_cast %100 : vector<1x16x16xf32> to vector<16x16xf32>
    %102 = arith.truncf %101 : vector<16x16xf32> to vector<16x16xbf16>
    %cst_67 = arith.constant dense<0.000000e+00> : vector<16x128xf32>
    %103 = tpu.matmul %102, %80, %cst_67 {dimension_numbers = #tpu.dot_dimension_numbers<[1], [0], [0], [1], [0, 0, 1, 1], [], []>} : vector<16x16xbf16>, vector<16x128xbf16>, vector<16x128xf32> -> vector<16x128xf32>
    %104 = arith.truncf %103 : vector<16x128xf32> to vector<16x128xbf16>
    %c2_68 = arith.constant 2 : index
    %c0_69 = arith.constant 0 : index
    %c0_70 = arith.constant 0 : index
    %105 = vector.load %arg7[%c2_68, %c0_69, %c0_70] : memref<3x128x128xbf16, #tpu.memory_space<vmem>>, vector<1x128x128xbf16>
    %106 = vector.shape_cast %105 : vector<1x128x128xbf16> to vector<128x128xbf16>
    %cst_71 = arith.constant dense<0.000000e+00> : vector<16x128xf32>
    %107 = tpu.matmul %104, %106, %cst_71 {dimension_numbers = #tpu.dot_dimension_numbers<[1], [0], [0], [1], [0, 0, 1, 1], [], []>} : vector<16x128xbf16>, vector<128x128xbf16>, vector<16x128xf32> -> vector<16x128xf32>
    %108 = arith.addf %99, %107 : vector<16x128xf32>
    %109 = vector.broadcast %79 : vector<1x128xf32> to vector<16x128xf32>
    %110 = arith.addf %108, %109 : vector<16x128xf32>
    %c1_72 = arith.constant 1 : index
    %c0_73 = arith.constant 0 : index
    %c0_74 = arith.constant 0 : index
    %111 = vector.load %arg9[%c1_72, %c0_73, %c0_74] : memref<3x16x32xf32, #tpu.memory_space<vmem>>, vector<1x16x32xf32>
    %112 = vector.shape_cast %111 : vector<1x16x32xf32> to vector<16x32xf32>
    %cst_75 = arith.constant dense<0.000000e+00> : vector<16x128xf32>
    %113 = tpu.matmul %112, %0, %cst_75 {dimension_numbers = #tpu.dot_dimension_numbers<[1], [0], [0], [1], [0, 0, 1, 1], [], []>} : vector<16x32xf32>, vector<32x128xf32>, vector<16x128xf32> -> vector<16x128xf32>
    %114 = arith.addf %110, %113 : vector<16x128xf32>
    %c0_76 = arith.constant 0 : index
    %c0_77 = arith.constant 0 : index
    %115 = vector.load %arg11[%c0_76, %c0_77] : memref<16x128xf32, #tpu.memory_space<vmem>>, vector<16x128xf32>
    tpu.vector_store %arg11[%c0_76, %c0_77], %114 {strides = array<i32>} : memref<16x128xf32, #tpu.memory_space<vmem>>, vector<16x128xf32>,
    return
  }
}

</mosaic_0001>

<bundles_post_ra>
// kernel: rsu_forward.1
= control target key start
LH: loop header
LB: loop body
LE: loop exit
PB: predicated region body
PF: predicated region fallthrough
CT: control target
= control target key end

     0   :  { %16 = vsyncpa [#allocation3], 0  ;;  %s1147_s20 = smov [#allocation2]   ;;  %s1148_s22 = smov 64   ;;  %s1390_s0 = inlined_call_operand.vmem [shape: f32[32,128], index: 0, kind: input, shape index: {}]   ;;  %s1391_s1 = inlined_call_operand.vmem [shape: f32[1,128], index: 1, kind: input, shape index: {}]   ;;  %s1392_s2 = inlined_call_operand.vmem [shape: f32[1,128], index: 2, kind: input, shape index: {}]   ;;  %s1393_s3 = inlined_call_operand.vmem [shape: bf16[3,128,128], index: 3, kind: input, shape index: {}]   ;;  %s1394_s4 = inlined_call_operand.vmem [shape: f32[1,128], index: 4, kind: input, shape index: {}]   ;;  %s1395_s5 = inlined_call_operand.vmem [shape: f32[1,128], index: 5, kind: input, shape index: {}]   ;;  %s1396_s6 = inlined_call_operand.vmem [shape: f32[1,128], index: 6, kind: input, shape index: {}]   ;;  %s1397_s7 = inlined_call_operand.hbm [shape: bf16[3,128,128], index: 7, kind: input, shape index: {}]   ;;  %s1398_s8 = inlined_call_operand.vmem [shape: f32[1,128], index: 8, kind: input, shape index: {}]   ;;  %s1399_s9 = inlined_call_operand.vmem [shape: f32[3,16,32], index: 9, kind: input, shape index: {}]   ;;  %s1400_s10 = inlined_call_operand.vmem [shape: f32[3,16,16], index: 10, kind: input, shape index: {}]   ;;  %s1401_s11 = inlined_call_operand.vmem [shape: f32[16,128], index: 11, kind: output, shape index: {}]  }
   0x1   :  { %s35_s19 = sshll.u32 %s1397_s7, 4  ;;  %s37_s21 = sshll.u32 %s1147_s20, 4  ;;  %s36_s19 = int_to_ptr.hbm [resolvable:$true] %s35_s19  ;;  %s38_s21 = int_to_ptr.vmem [resolvable:$true] %s37_s21 }
   0x2   :  { %s1149_s23 = smov 4  }
   0x3   :  { %43 = dma.hbm_to_vmem [thread:$0]  %s36_s19, 3072, %s38_s21, [#allocation3], %s1148_s22, %s1148_s22, %s1149_s23  }
   0x4   :  { %1145 = dma.done.wait [#allocation3], 3072  }
   0x5   :  { %1146 = vsyncadd [#allocation3], 4294964224  ;;  %v1216_v0 = vld [vmem:[%s1390_s0] sm:$0xff]  ;;  %v1221_v1 = vld [vmem:[%s1390_s0 + $0x8] sm:$0xff]  ;;  %vm123_vm3 = vcmask 261120   ;;  %vm478_vm7 = vcmask 130048  }
   0x6   :  { %v1226_v2 = vld [vmem:[%s1390_s0 + $0x10] sm:$0xff]  ;;  %v1231_v3 = vld [vmem:[%s1390_s0 + $0x18] sm:$0xff]  ;;  %v61_v4 = vadd.f32 %v1221_v1, %v1216_v0  ;;  %v59_v38 = vld [vmem:[%s1391_s1] sm:$0x1] }
   0x7   :  { %v1113_v43 = vld [vmem:[%s1392_s2] ss:$0 sm:$0xff]  ;;  %v1077_v44 = vld [vmem:[%s1393_s3 + $0x78] sm:$0xff]  ;;  %v1076_v50 = vld [vmem:[%s1393_s3 + $0x70] sm:$0xff] }
   0x8   :  { %v62_v5 = vadd.f32 %v61_v4, %v1226_v2  ;;  %v1069_v45 = vld [vmem:[%s1393_s3 + $0x38] sm:$0xff]  ;;  %245 = vmatpush.bf16.msra.mxu2 %v1077_v44  ;;  %v1068_v51 = vld [vmem:[%s1393_s3 + $0x30] sm:$0xff]  ;;  %v1075_v60 = vld [vmem:[%s1393_s3 + $0x68] sm:$0xff] }
   0x9   :  { %307 = vmatpush.bf16.msra.mxu3 %v1069_v45  ;;  %v1067_v61 = vld [vmem:[%s1393_s3 + $0x28] sm:$0xff]  ;;  %v120_v63 = vld [vmem:[%s1399_s9] sm:$0xff] }
   0xa   :  { %v63_v6 = vadd.f32 %v62_v5, %v1231_v3  ;;  %v121_v5 = vld [vmem:[%s1399_s9 + $0x8] sm:$0xff] }
   0xc   :  { %v64_v7 = vrot.slane %v63_v6, 4  ;;  %246 = vmatpush.bf16.msra.mxu2 %v1076_v50 }
   0xd   :  { %308 = vmatpush.bf16.msra.mxu3 %v1068_v51 }
   0xe   :  { %v65_v8 = vadd.f32 %v64_v7, %v63_v6  ;;  %v1274_v6 = vld [vmem:[%s1399_s9 + $0x10] sm:$0xff]  ;;  %v1279_v7 = vld [vmem:[%s1399_s9 + $0x18] sm:$0xff] }
  0x10   :  { %v66_v9 = vrot.slane %v65_v8, 2  ;;  %247 = vmatpush.bf16.msra.mxu2 %v1075_v60 }
  0x11   :  { %309 = vmatpush.bf16.msra.mxu3 %v1067_v61 }
  0x12   :  { %v67_v10 = vadd.f32 %v66_v9, %v65_v8  ;;  %v1074_v8 = vld [vmem:[%s1393_s3 + $0x60] sm:$0xff] }
  0x13   :  { %v1066_v9 = vld [vmem:[%s1393_s3 + $0x20] sm:$0xff] }
  0x14   :  { %v68_v11 = vrot.slane %v67_v10, 1  ;;  %248 = vmatpush.bf16.msra.mxu2 %v1074_v8 }
  0x15   :  { %310 = vmatpush.bf16.msra.mxu3 %v1066_v9 }
  0x16   :  { %v69_v12 = vadd.f32 %v68_v11, %v67_v10  ;;  %v1085_v10 = vld [vmem:[%s1393_s3 + $0xb8] sm:$0xff]  ;;  %v122_v11 = vpack.c.bf16 %v121_v5, %v120_v63 }
  0x18   :  { %v70_v13 = vmul.f32 0.03125, %v69_v12  ;;  %v161_v12 = vpack.c.bf16 %v1279_v7, %v1274_v6 }
  0x1a   :  { %v71_v14 = vsub.f32 %v1216_v0, %v70_v13  ;;  %v72_v15 = vsub.f32 %v1221_v1, %v70_v13  ;;  %v73_v16 = vsub.f32 %v1226_v2, %v70_v13  ;;  %v74_v17 = vsub.f32 %v1231_v3, %v70_v13  ;;  %v1073_v13 = vld [vmem:[%s1393_s3 + $0x58] sm:$0xff] }
  0x1b   :  { %249 = vmatpush.bf16.msra.mxu2 %v1073_v13 }
  0x1c   :  { %v75_v18 = vmul.f32 %v71_v14, %v71_v14  ;;  %v76_v19 = vmul.f32 %v72_v15, %v72_v15  ;;  %v77_v20 = vmul.f32 %v73_v16, %v73_v16  ;;  %v78_v21 = vmul.f32 %v74_v17, %v74_v17 }
  0x1e   :  { %v79_v22 = vadd.f32 %v76_v19, %v75_v18  ;;  %v1072_v18 = vld [vmem:[%s1393_s3 + $0x50] sm:$0xff] }
  0x1f   :  { %v1064_v19 = vld [vmem:[%s1393_s3 + $0x10] sm:$0xff]  ;;  %250 = vmatpush.bf16.msra.mxu2 %v1072_v18 }
  0x20   :  { %v80_v23 = vadd.f32 %v79_v22, %v77_v20  ;;  %v1084_v20 = vld [vmem:[%s1393_s3 + $0xb0] sm:$0xff]  ;;  %v1063_v22 = vld [vmem:[%s1393_s3 + $0x8] sm:$0xff] }
  0x22   :  { %v81_v24 = vadd.f32 %v80_v23, %v78_v21  ;;  %v1071_v21 = vld [vmem:[%s1393_s3 + $0x48] sm:$0xff] }
  0x23   :  { %v1083_v23 = vld [vmem:[%s1393_s3 + $0xa8] sm:$0xff]  ;;  %251 = vmatpush.bf16.msra.mxu2 %v1071_v21 }
  0x24   :  { %v82_v25 = vrot.slane %v81_v24, 4 }
  0x26   :  { %v83_v26 = vadd.f32 %v82_v25, %v81_v24  ;;  %v1070_v24 = vld [vmem:[%s1393_s3 + $0x40] sm:$0xff] }
  0x27   :  { %v1062_v25 = vld [vmem:[%s1393_s3] sm:$0xff]  ;;  %252 = vmatpush.bf16.msra.mxu2 %v1070_v24 }
  0x28   :  { %v84_v27 = vrot.slane %v83_v26, 2 }
  0x2a   :  { %v85_v28 = vadd.f32 %v84_v27, %v83_v26  ;;  %v1082_v26 = vld [vmem:[%s1393_s3 + $0xa0] sm:$0xff]  ;;  %v1081_v27 = vld [vmem:[%s1393_s3 + $0x98] sm:$0xff] }
  0x2c   :  { %v86_v29 = vrot.slane %v85_v28, 1 }
  0x2e   :  { %v87_v30 = vadd.f32 %v86_v29, %v85_v28  ;;  %v1080_v28 = vld [vmem:[%s1393_s3 + $0x90] sm:$0xff]  ;;  %v1079_v29 = vld [vmem:[%s1393_s3 + $0x88] sm:$0xff] }
  0x30   :  { %v88_v31 = vmul.f32 0.03125, %v87_v30  ;;  %v1078_v30 = vld [vmem:[%s1393_s3 + $0x80] sm:$0xff] }
  0x32   :  { %v89_v32 = vadd.f32 1e-05, %v88_v31 }
  0x34   :  { %1117 = vrsqrt.f32 %v89_v32  ;;  %vm96_vm0 = vweird.f32 %v89_v32 }
  0x3a   :  { %v1118_v33 = vpop.eup %1117 }
  0x3b   :  { %v91_v34 = vmul.f32 %v1118_v33, %v89_v32  ;;  %vm97_vm1 = vweird.f32 %v1118_v33 }
  0x3c   :  { %vm98_vm2 = vmor %vm96_vm0, %vm97_vm1 }
  0x3d   :  { %v92_v35 = vmul.f32 %v1118_v33, %v91_v34 }
  0x3f   :  { %v93_v36 = vmul.f32 0.5, %v92_v35 }
  0x41   :  { %v94_v37 = vsub.f32 1.5, %v93_v36 }
  0x43   :  { %v95_v39 = vmul.f32 %v1118_v33, %v94_v37 }
  0x45   :  { %v99_v40 = vsel %vm98_vm2, %v1118_v33, %v95_v39 }
  0x46   :  { %v100_v41 = vmul.f32 %v99_v40, %v59_v38 }
  0x48   :  { %v101_v42 = vperm.slane %v100_v41, 0 }
  0x4a   :  { %v104_v46 = vmul.f32 %v101_v42, %v73_v16  ;;  %v105_v47 = vmul.f32 %v101_v42, %v74_v17  ;;  %v102_v48 = vmul.f32 %v101_v42, %v71_v14  ;;  %v103_v49 = vmul.f32 %v101_v42, %v72_v15  ;;  %v1065_v14 = vld [vmem:[%s1393_s3 + $0x18] sm:$0xff]  ;;  %v906_v15 = vld [vmem:[%s1399_s9 + $0x20] sm:$0xff]  ;;  %v907_v16 = vld [vmem:[%s1399_s9 + $0x28] sm:$0xff] }
  0x4b   :  { %311 = vmatpush.bf16.msra.mxu3 %v1065_v14  ;;  %v324_v17 = vpack.c.bf16 %v907_v16, %v906_v15  ;;  %v1101_v16 = vld [vmem:[#allocation2 + $0x78] sm:$0xff] }
  0x4c   :  { %v111_v52 = vadd.f32 %v1113_v43, %v104_v46  ;;  %v112_v53 = vadd.f32 %v1113_v43, %v105_v47  ;;  %v109_v54 = vadd.f32 %v1113_v43, %v102_v48  ;;  %v110_v55 = vadd.f32 %v1113_v43, %v103_v49  ;;  %v1114_v48 = vld [vmem:[%s1394_s4] ss:$0 sm:$0xff] }
  0x4e   :  { %v115_v56 = vmax.f32 %v111_v52, 0.0  ;;  %v116_v57 = vmax.f32 %v112_v53, 0.0  ;;  %v113_v58 = vmax.f32 %v109_v54, 0.0  ;;  %v114_v59 = vmax.f32 %v110_v55, 0.0 }
  0x4f   :  { %312 = vmatpush.bf16.msra.mxu3 %v1064_v19 }
  0x50   :  { %v119_v62 = vpack.c.bf16 %v116_v57, %v115_v56  ;;  %v118_v4 = vpack.c.bf16 %v114_v59, %v113_v58 }
  0x52   :  { %133 = vmatpush.bf16.msra.mxu0 %v119_v62  ;;  %171 = vmatpush.bf16.msra.mxu1 %v119_v62 }
  0x53   :  { %313 = vmatpush.bf16.msra.mxu3 %v1063_v22 }
  0x56   :  { %134 = vmatpush.bf16.msra.mxu0 %v118_v4  ;;  %172 = vmatpush.bf16.msra.mxu1 %v118_v4 }
  0x57   :  { %314 = vmatpush.bf16.msra.mxu3 %v1062_v25  ;;  %v429_v25 = vld [vmem:[%s1395_s5] sm:$0x1] }
  0x59   :  { %822 = vmatmul.msk.bf16.vlgmr.msra.gmra.mxu0 %vm123_vm3, %v122_v11  ;;  %825 = vmatmul.msk.bf16.vlgmr.msra.gmra.mxu1 %vm123_vm3, %v161_v12 }
  0x5a   :  { %334 = vmatpush.bf16.msrb.mxu0 %v119_v62  ;;  %408 = vmatpush.bf16.msrb.mxu1 %v1085_v10 }
  0x5b   :  { %600 = vmatpush.bf16.msrb.mxu3 %v1101_v16  ;;  %v1116_v16 = vld [vmem:[%s1398_s8] ss:$0 sm:$0xff] }
  0x5e   :  { %335 = vmatpush.bf16.msrb.mxu0 %v118_v4  ;;  %409 = vmatpush.bf16.msrb.mxu1 %v1084_v20  ;;  %v1099_v20 = vld [vmem:[#allocation2 + $0x68] sm:$0xff] }
  0x62   :  { %410 = vmatpush.bf16.msrb.mxu1 %v1083_v23  ;;  %v1098_v23 = vld [vmem:[#allocation2 + $0x60] sm:$0xff] }
  0x66   :  { %411 = vmatpush.bf16.msrb.mxu1 %v1082_v26 }
  0x69   :  { %908 = vmatmul.msk.bf16.vlgmr.msrb.gmra.mxu0 %vm123_vm3, %v324_v17  ;;  %v1100_v17 = vld [vmem:[#allocation2 + $0x70] sm:$0xff] }
  0x6a   :  { %412 = vmatpush.bf16.msrb.mxu1 %v1081_v27  ;;  %601 = vmatpush.bf16.msrb.mxu3 %v1100_v17  ;;  %v1097_v27 = vld [vmem:[#allocation2 + $0x58] sm:$0xff] }
  0x6e   :  { %413 = vmatpush.bf16.msrb.mxu1 %v1080_v28  ;;  %602 = vmatpush.bf16.msrb.mxu3 %v1099_v20 }
  0x72   :  { %414 = vmatpush.bf16.msrb.mxu1 %v1079_v29  ;;  %603 = vmatpush.bf16.msrb.mxu3 %v1098_v23 }
  0x76   :  { %415 = vmatpush.bf16.msrb.mxu1 %v1078_v30  ;;  %604 = vmatpush.bf16.msrb.mxu3 %v1097_v27 }
  0xd6   :  { %v136_v31 = vpop.f32.mrf.mxu0  ;;  %v174_v32 = vpop.f32.mrf.mxu1 }
  0xde   :  { %v138_v33 = vpop.f32.mrf.mxu0  ;;  %v176_v34 = vpop.f32.mrf.mxu1 }
  0xdf   :  { %v141_v35 = vpack.c.bf16 %v138_v33, %v136_v31  ;;  %v179_v36 = vpack.c.bf16 %v176_v34, %v174_v32  ;;  %v1115_v31 = vld [vmem:[%s1396_s6] ss:$0 sm:$0xff] }
  0xe1   :  { %253 = vmatmul.bf16.vlgmr.msra.gmra.mxu2 %v179_v36  ;;  %315 = vmatmul.bf16.vlgmr.msra.gmra.mxu3 %v141_v35  ;;  %v958_v36 = vld [vmem:[%s1400_s10 + $0x10] sm:$0xff] }
  0xe6   :  { %v337_v37 = vpop.f32.mrf.mxu0 }
  0xee   :  { %v339_v38 = vpop.f32.mrf.mxu0 }
  0xef   :  { %v342_v39 = vpack.c.bf16 %v339_v38, %v337_v37 }
  0xf1   :  { %416 = vmatmul.bf16.vlgmr.msrb.gmra.mxu1 %v342_v39  ;;  %v959_v39 = vld [vmem:[%s1400_s10 + $0x18] sm:$0xff] }
 0x164   :  { %v254_v40 = vpop.f32.mrf.mxu2  ;;  %v316_v41 = vpop.f32.mrf.mxu3 }
 0x165   :  { %v317_v45 = vadd.f32 %v316_v41, %v254_v40  ;;  %v475_v40 = vld [vmem:[%s1400_s10] sm:$0xff]  ;;  %v476_v41 = vld [vmem:[%s1400_s10 + $0x8] sm:$0xff] }
 0x16c   :  { %v256_v43 = vpop.f32.mrf.mxu2  ;;  %v318_v44 = vpop.f32.mrf.mxu3 }
 0x16d   :  { %v319_v46 = vadd.f32 %v318_v44, %v256_v43  ;;  %v1026_v43 = vld [vmem:[%s1400_s10 + $0x28] sm:$0xff]  ;;  %v1109_v44 = vld [vmem:[#allocation2 + $0xb8] sm:$0xff] }
 0x16e   :  { %v417_v42 = vpop.f32.mrf.mxu1 }
 0x16f   :  { %v422_v47 = vadd.f32 %v417_v42, %v317_v45  ;;  %v1025_v42 = vld [vmem:[%s1400_s10 + $0x20] sm:$0xff] }
 0x171   :  { %v427_v51 = vadd.f32 %v1114_v48, %v422_v47  ;;  %v516_v47 = vpack.c.bf16 %v959_v39, %v958_v36 }
 0x176   :  { %v419_v49 = vpop.f32.mrf.mxu1 }
 0x177   :  { %v423_v50 = vadd.f32 %v419_v49, %v319_v46  ;;  %v1093_v46 = vld [vmem:[#allocation2 + $0x38] sm:$0xff]  ;;  %v679_v49 = vpack.c.bf16 %v1026_v43, %v1025_v42 }
 0x179   :  { %v428_v52 = vadd.f32 %v1114_v48, %v423_v50  ;;  %v477_v48 = vpack.c.bf16 %v476_v41, %v475_v40  ;;  %v1108_v50 = vld [vmem:[#allocation2 + $0xb0] sm:$0xff] }
 0x17b   :  { %v431_v53 = vadd.f32 %v428_v52, %v427_v51 }
 0x17d   :  { %v432_v54 = vrot.slane %v431_v53, 4 }
 0x17f   :  { %v433_v55 = vadd.f32 %v432_v54, %v431_v53  ;;  %v1091_v53 = vld [vmem:[#allocation2 + $0x28] sm:$0xff]  ;;  %v1106_v54 = vld [vmem:[#allocation2 + $0xa0] sm:$0xff] }
 0x181   :  { %v434_v56 = vrot.slane %v433_v55, 2 }
 0x183   :  { %v435_v57 = vadd.f32 %v434_v56, %v433_v55  ;;  %v1090_v55 = vld [vmem:[#allocation2 + $0x20] sm:$0xff]  ;;  %v1105_v56 = vld [vmem:[#allocation2 + $0x98] sm:$0xff] }
 0x185   :  { %v436_v58 = vrot.slane %v435_v57, 1 }
 0x187   :  { %v437_v59 = vadd.f32 %v436_v58, %v435_v57  ;;  %v1103_v57 = vld [vmem:[#allocation2 + $0x88] sm:$0xff]  ;;  %v1096_v58 = vld [vmem:[#allocation2 + $0x50] sm:$0xff] }
 0x188   :  { %605 = vmatpush.bf16.msrb.mxu3 %v1096_v58 }
 0x189   :  { %v438_v60 = vmul.f32 0.0625, %v437_v59  ;;  %v1095_v59 = vld [vmem:[#allocation2 + $0x48] sm:$0xff] }
 0x18b   :  { %v439_v61 = vsub.f32 %v427_v51, %v438_v60  ;;  %v440_v62 = vsub.f32 %v428_v52, %v438_v60  ;;  %v1092_v51 = vld [vmem:[#allocation2 + $0x30] sm:$0xff]  ;;  %v1107_v52 = vld [vmem:[#allocation2 + $0xa8] sm:$0xff]  ;;  %v1102_v60 = vld [vmem:[#allocation2 + $0x80] sm:$0xff] }
 0x18c   :  { %606 = vmatpush.bf16.msrb.mxu3 %v1095_v59 }
 0x18d   :  { %v441_v63 = vmul.f32 %v439_v61, %v439_v61  ;;  %v442_v4 = vmul.f32 %v440_v62, %v440_v62 }
 0x18f   :  { %v443_v5 = vadd.f32 %v442_v4, %v441_v63 }
 0x191   :  { %v444_v8 = vrot.slane %v443_v5, 4 }
 0x193   :  { %v445_v9 = vadd.f32 %v444_v8, %v443_v5 }
 0x195   :  { %v446_v10 = vrot.slane %v445_v9, 2 }
 0x197   :  { %v447_v11 = vadd.f32 %v446_v10, %v445_v9 }
 0x199   :  { %v448_v12 = vrot.slane %v447_v11, 1 }
 0x19b   :  { %v449_v13 = vadd.f32 %v448_v12, %v447_v11 }
 0x19d   :  { %v450_v14 = vmul.f32 0.0625, %v449_v13 }
 0x19f   :  { %v451_v15 = vadd.f32 1e-05, %v450_v14 }
 0x1a1   :  { %1119 = vrsqrt.f32 %v451_v15  ;;  %vm458_vm5 = vweird.f32 %v451_v15 }
 0x1a7   :  { %v1120_v18 = vpop.eup %1119 }
 0x1a8   :  { %v453_v19 = vmul.f32 %v1120_v18, %v451_v15  ;;  %vm459_vm4 = vweird.f32 %v1120_v18 }
 0x1a9   :  { %vm460_vm6 = vmor %vm458_vm5, %vm459_vm4 }
 0x1aa   :  { %v454_v21 = vmul.f32 %v1120_v18, %v453_v19 }
 0x1ac   :  { %v455_v22 = vmul.f32 0.5, %v454_v21 }
 0x1ae   :  { %v456_v24 = vsub.f32 1.5, %v455_v22 }
 0x1b0   :  { %v457_v26 = vmul.f32 %v1120_v18, %v456_v24 }
 0x1b2   :  { %v461_v28 = vsel %vm460_vm6, %v1120_v18, %v457_v26 }
 0x1b3   :  { %v462_v29 = vmul.f32 %v461_v28, %v429_v25 }
 0x1b5   :  { %v463_v30 = vperm.slane %v462_v29, 0 }
 0x1b7   :  { %v464_v32 = vmul.f32 %v463_v30, %v439_v61  ;;  %v465_v33 = vmul.f32 %v463_v30, %v440_v62  ;;  %v1086_v61 = vld [vmem:[#allocation2] sm:$0xff] }
 0x1b9   :  { %v470_v34 = vadd.f32 %v1115_v31, %v465_v33  ;;  %v469_v35 = vadd.f32 %v1115_v31, %v464_v32 }
 0x1bb   :  { %v472_v37 = vmax.f32 %v470_v34, 0.0  ;;  %v471_v38 = vmax.f32 %v469_v35, 0.0 }
 0x1bd   :  { %v474_v45 = vpack.c.bf16 %v472_v37, %v471_v38 }
 0x1bf   :  { %489 = vmatpush.bf16.msra.mxu0 %v474_v45  ;;  %527 = vmatpush.bf16.msrb.mxu2 %v474_v45 }
 0x1c0   :  { %690 = vmatpush.bf16.msra.mxu1 %v474_v45 }
 0x1c2   :  { %960 = vmatmul.msk.bf16.vlgmr.msrb.gmra.mxu2 %vm478_vm7, %v516_v47  ;;  %957 = vmatmul.msk.bf16.vlgmr.msra.gmra.mxu0 %vm478_vm7, %v477_v48 }
 0x1c3   :  { %763 = vmatpush.bf16.msra.mxu2 %v1109_v44  ;;  %662 = vmatpush.bf16.msrb.mxu0 %v1093_v46 }
 0x1c4   :  { %802 = vmatpush.msrb.mxu1 %v1231_v3  ;;  %v1089_v3 = vld [vmem:[#allocation2 + $0x18] sm:$0xff] }
 0x1c5   :  { %1027 = vmatmul.msk.bf16.vlgmr.msra.gmra.mxu1 %vm478_vm7, %v679_v49 }
 0x1c6   :  { %803 = vmatpush.msrb.mxu1 %v1226_v2  ;;  %v1104_v2 = vld [vmem:[#allocation2 + $0x90] sm:$0xff] }
 0x1c7   :  { %764 = vmatpush.bf16.msra.mxu2 %v1108_v50  ;;  %663 = vmatpush.bf16.msrb.mxu0 %v1092_v51 }
 0x1c8   :  { %804 = vmatpush.msrb.mxu1 %v1221_v1  ;;  %v1088_v1 = vld [vmem:[#allocation2 + $0x10] sm:$0xff] }
 0x1ca   :  { %805 = vmatpush.msrb.mxu1 %v1216_v0  ;;  %v1087_v0 = vld [vmem:[#allocation2 + $0x8] sm:$0xff] }
 0x1cb   :  { %765 = vmatpush.bf16.msra.mxu2 %v1107_v52  ;;  %664 = vmatpush.bf16.msrb.mxu0 %v1091_v53 }
 0x1cf   :  { %766 = vmatpush.bf16.msra.mxu2 %v1106_v54  ;;  %665 = vmatpush.bf16.msrb.mxu0 %v1090_v55 }
 0x1d3   :  { %767 = vmatpush.bf16.msra.mxu2 %v1105_v56  ;;  %666 = vmatpush.bf16.msrb.mxu0 %v1089_v3 }
 0x1d5   :  { %1060 = vmatmul.msk.f32.vlgmr.msrb.gmra.mxu1 %vm123_vm3, %v1274_v6  ;;  %v1094_v6 = vld [vmem:[#allocation2 + $0x40] sm:$0xff] }
 0x1d6   :  { %607 = vmatpush.bf16.msrb.mxu3 %v1094_v6 }
 0x1d7   :  { %768 = vmatpush.bf16.msra.mxu2 %v1104_v2  ;;  %667 = vmatpush.bf16.msrb.mxu0 %v1088_v1 }
 0x1db   :  { %769 = vmatpush.bf16.msra.mxu2 %v1103_v57  ;;  %668 = vmatpush.bf16.msrb.mxu0 %v1087_v0 }
 0x1dd   :  { %1061 = vmatmul.msk.f32.gmra.mxu1 %vm123_vm3, %v1279_v7 }
 0x1df   :  { %770 = vmatpush.bf16.msra.mxu2 %v1102_v60  ;;  %669 = vmatpush.bf16.msrb.mxu0 %v1086_v61 }
 0x23f   :  { %v491_v62 = vpop.f32.mrf.mxu0 }
 0x242   :  { %v692_v7 = vpop.f32.mrf.mxu1 }
 0x245   :  { %v529_v63 = vpop.f32.mrf.mxu2 }
 0x247   :  { %v493_v4 = vpop.f32.mrf.mxu0 }
 0x248   :  { %v496_v8 = vpack.c.bf16 %v493_v4, %v491_v62 }
 0x24a   :  { %v694_v5 = vpop.f32.mrf.mxu1  ;;  %670 = vmatmul.bf16.vlgmr.msrb.gmra.mxu0 %v496_v8 }
 0x24b   :  { %v697_v9 = vpack.c.bf16 %v694_v5, %v692_v7 }
 0x24d   :  { %771 = vmatmul.bf16.vlgmr.msra.gmra.mxu2 %v697_v9  ;;  %v531_v10 = vpop.f32.mrf.mxu2 }
 0x24e   :  { %v534_v11 = vpack.c.bf16 %v531_v10, %v529_v63 }
 0x250   :  { %608 = vmatmul.bf16.vlgmr.msrb.gmra.mxu3 %v534_v11 }
 0x252   :  { %v807_v17 = vpop.f32.mrf.mxu1 }
 0x25a   :  { %v810_v26 = vpop.f32.mrf.mxu1 }
 0x2c7   :  { %v671_v12 = vpop.f32.mrf.mxu0 }
 0x2cf   :  { %v673_v21 = vpop.f32.mrf.mxu0 }
 0x2d0   :  { %v772_v13 = vpop.f32.mrf.mxu2 }
 0x2d3   :  { %v609_v14 = vpop.f32.mrf.mxu3 }
 0x2d4   :  { %v672_v15 = vadd.f32 %v671_v12, %v609_v14 }
 0x2d6   :  { %v777_v18 = vadd.f32 %v772_v13, %v672_v15 }
 0x2d8   :  { %v782_v19 = vadd.f32 %v1116_v16, %v777_v18  ;;  %v774_v24 = vpop.f32.mrf.mxu2 }
 0x2da   :  { %v813_v20 = vadd.f32 %v807_v17, %v782_v19 }
 0x2db   :  { %v611_v22 = vpop.f32.mrf.mxu3 }
 0x2dc   :  { %815 = vst [vmem:[%s1401_s11] sm:$0xff] %v813_v20  ;;  %v674_v23 = vadd.f32 %v673_v21, %v611_v22 }
 0x2de   :  { %v778_v25 = vadd.f32 %v774_v24, %v674_v23 }
 0x2e0   :  { %v783_v27 = vadd.f32 %v1116_v16, %v778_v25 }
 0x2e2   :  { %v814_v28 = vadd.f32 %v810_v26, %v783_v27 }
 0x2e4   :  { %816 = vst [vmem:[%s1401_s11 + $0x8] sm:$0xff] %v814_v28 }
 0x2e5   :  { %821 = vsyncpa [#allocation3], 1 }

</bundles_post_ra>
